<compile_context>
chip_gen: v5e
topology: v5e:2x2
jax: 0.10.0
libtpu: 0.0.40
codegen_flags: <defaults>
</compile_context>

<pallas_src>
import math
from functools import partial

import jax
import jax.numpy as jnp
from jax.experimental import pallas as pl
from jax.experimental.pallas import tpu as pltpu

_MASK_VALUE = -1e30  # large-negative instead of -inf keeps online softmax NaN-free


# ---------------------------------------------------------------------------
# helpers
# ---------------------------------------------------------------------------
def _round_up(x: int, m: int) -> int:
    return ((x + m - 1) // m) * m


def _tile_and_pad(dim: int, preferred: int):
    """Pick a VMEM-bounded tile (<= preferred) and the padded dimension size."""
    if dim <= preferred:
        return dim, dim                     # single full-extent block, no padding
    return preferred, _round_up(dim, preferred)


# ---------------------------------------------------------------------------
# Kernel 1: tiled linear layer  y = x @ W + b   (q/k/v/output projections)
# ---------------------------------------------------------------------------
def _linear_kernel(x_ref, w_ref, b_ref, o_ref, acc_ref):
    @pl.when(pl.program_id(2) == 0)
    def _():
        acc_ref[...] = jnp.zeros_like(acc_ref)

    # bf16 operands into the MXU, f32 accumulation.
    acc_ref[...] += jnp.dot(x_ref[...].astype(jnp.bfloat16),
                            w_ref[...].astype(jnp.bfloat16),
                            preferred_element_type=jnp.float32)

    @pl.when(pl.program_id(2) == pl.num_programs(2) - 1)
    def _():
        o_ref[...] = (acc_ref[...] + b_ref[...].astype(jnp.float32)).astype(o_ref.dtype)


def linear(x, w, b, *, bm=512, bn=512, bk=1024):
    """x: [R, K], w: [K, N], b: [N] -> [R, N].  Pads non-divisible dims with zeros."""
    R, K = x.shape
    Kw, N = w.shape
    assert K == Kw and b.shape == (N,)
    bm = _round_up(bm, 8)
    bn = _round_up(bn, 128)
    bk = _round_up(bk, 128)

    tm, R_pad = _tile_and_pad(R, bm)
    tn, N_pad = _tile_and_pad(N, bn)
    tk, K_pad = _tile_and_pad(K, bk)

    if R_pad != R or K_pad != K:
        x = jnp.pad(x, ((0, R_pad - R), (0, K_pad - K)))
    if K_pad != K or N_pad != N:
        w = jnp.pad(w, ((0, K_pad - K), (0, N_pad - N)))
    if N_pad != N:
        b = jnp.pad(b, (0, N_pad - N))

    grid = (R_pad // tm, N_pad // tn, K_pad // tk)
    out = pl.pallas_call(
        _linear_kernel,
        out_shape=jax.ShapeDtypeStruct((R_pad, N_pad), x.dtype),
        grid_spec=pltpu.PrefetchScalarGridSpec(
            num_scalar_prefetch=0,
            grid=grid,
            in_specs=[
                pl.BlockSpec((tm, tk), lambda i, j, kk: (i, kk)),
                pl.BlockSpec((tk, tn), lambda i, j, kk: (kk, j)),
                pl.BlockSpec((1, tn), lambda i, j, kk: (0, j)),
            ],
            out_specs=pl.BlockSpec((tm, tn), lambda i, j, kk: (i, j)),
            scratch_shapes=[pltpu.VMEM((tm, tn), jnp.float32)],
        ),
        compiler_params=pltpu.CompilerParams(
            dimension_semantics=("parallel", "parallel", "arbitrary")),
    )(x, w, b.reshape(1, N_pad))

    if R_pad != R or N_pad != N:
        out = out[:R, :N]
    return out


# ---------------------------------------------------------------------------
# Kernel 2: flash-style attention, all heads per grid step, no HBM transposes
# q: [B, Mq, H, Dh], k/v: [B, Mk, H, Dh], mask: [B, 1, Mk] int32 -> out: [B, Mq, H*Dh]
# ---------------------------------------------------------------------------
def _attention_kernel(q_ref, k_ref, v_ref, mask_ref, o_ref,
                      m_sc, l_sc, acc_sc, *, num_heads, head_dim):
    kv = pl.program_id(2)

    @pl.when(kv == 0)
    def _():
        m_sc[...] = jnp.full_like(m_sc, -jnp.inf)
        l_sc[...] = jnp.zeros_like(l_sc)
        acc_sc[...] = jnp.zeros_like(acc_sc)

    keep = mask_ref[...] > 0                                    # (1, tkv)

    for h in range(num_heads):                                  # static unroll over heads
        q_h = q_ref[:, h, :].astype(jnp.bfloat16)               # (tq, Dh)  bf16 -> MXU
        k_h = k_ref[:, h, :].astype(jnp.bfloat16)               # (tkv, Dh)
        # scores = q @ k^T (contract on Dh); 1/sqrt(Dh) already folded into Wq.
        s = jax.lax.dot_general(q_h, k_h, (((1,), (1,)), ((), ())),
                                preferred_element_type=jnp.float32)   # (tq, tkv) f32
        s = jnp.where(keep, s, _MASK_VALUE)

        m_prev = m_sc[h]                                        # (tq, 1) f32
        m_new = jnp.maximum(m_prev, s.max(axis=-1, keepdims=True))
        alpha = jnp.exp(m_prev - m_new)
        p = jnp.exp(s - m_new)                                  # (tq, tkv) f32
        l_sc[h] = alpha * l_sc[h] + p.sum(axis=-1, keepdims=True)
        acc_sc[h] = alpha * acc_sc[h] + jnp.dot(
            p.astype(jnp.bfloat16), v_ref[:, h, :].astype(jnp.bfloat16),
            preferred_element_type=jnp.float32)                 # (tq, Dh) f32
        m_sc[h] = m_new

    @pl.when(kv == pl.num_programs(2) - 1)
    def _():
        for h in range(num_heads):
            inv_l = pl.reciprocal(l_sc[h], approx=True)         # (tq, 1), EUP slot
            o_ref[:, h * head_dim:(h + 1) * head_dim] = (
                acc_sc[h] * inv_l).astype(o_ref.dtype)          # lane-dense (tq, D) block


def attention_core(q, k, v, mask, *, block_q=512, block_kv=1024):
    """q: [B,Mq,H,Dh], k/v: [B,Mk,H,Dh], mask: [B,1,Mk] int32 -> [B,Mq,H*Dh]."""
    B, Mq, H, Dh = q.shape
    Mk = k.shape[1]
    D = H * Dh
    assert k.shape == (B, Mk, H, Dh) and v.shape == (B, Mk, H, Dh)

    block_q = _round_up(block_q, 8)
    block_kv = _round_up(block_kv, 128)
    tq, Mq_pad = _tile_and_pad(Mq, block_q)
    tkv, Mk_pad = _tile_and_pad(Mk, block_kv)

    if Mq_pad != Mq:
        q = jnp.pad(q, ((0, 0), (0, Mq_pad - Mq), (0, 0), (0, 0)))
    if Mk_pad != Mk:
        k = jnp.pad(k, ((0, 0), (0, Mk_pad - Mk), (0, 0), (0, 0)))
        v = jnp.pad(v, ((0, 0), (0, Mk_pad - Mk), (0, 0), (0, 0)))
        mask = jnp.pad(mask, ((0, 0), (0, 0), (0, Mk_pad - Mk)))   # pad keys are masked out

    grid = (B, Mq_pad // tq, Mk_pad // tkv)
    out = pl.pallas_call(
        partial(_attention_kernel, num_heads=H, head_dim=Dh),
        out_shape=jax.ShapeDtypeStruct((B, Mq_pad, D), q.dtype),
        grid_spec=pltpu.PrefetchScalarGridSpec(
            num_scalar_prefetch=0,
            grid=grid,
            in_specs=[
                pl.BlockSpec((None, tq, H, Dh), lambda b, i, j: (b, i, 0, 0)),
                pl.BlockSpec((None, tkv, H, Dh), lambda b, i, j: (b, j, 0, 0)),
                pl.BlockSpec((None, tkv, H, Dh), lambda b, i, j: (b, j, 0, 0)),
                pl.BlockSpec((None, 1, tkv), lambda b, i, j: (b, 0, j)),
            ],
            out_specs=pl.BlockSpec((None, tq, D), lambda b, i, j: (b, i, 0)),
            scratch_shapes=[
                pltpu.VMEM((H, tq, 1), jnp.float32),    # running max per head
                pltpu.VMEM((H, tq, 1), jnp.float32),    # running denom per head
                pltpu.VMEM((H, tq, Dh), jnp.float32),   # output accumulator per head
            ],
        ),
        compiler_params=pltpu.CompilerParams(
            dimension_semantics=("parallel", "parallel", "arbitrary")),
    )(q, k, v, mask)

    if Mq_pad != Mq:
        out = out[:, :Mq, :]
    return out


# ---------------------------------------------------------------------------
# Full MultiHeadedAttention forward
# ---------------------------------------------------------------------------
def multi_headed_attention(params, k, v, q, mask=None, *, num_heads,
                           block_q=512, block_kv=1024):
    """Forward pass of MultiHeadedAttention (inference path; dropout = identity).

    k, v: [B, Mk, D]; q: [B, Mq, D]; mask: [B, 1, Mk] (truthy = attend) or None.
    Weights are stored as [in, out] (PyTorch weight transposed).
    """
    B, Mq, D = q.shape
    Mk = k.shape[1]
    assert D % num_heads == 0
    head_size = D // num_heads
    scale = 1.0 / math.sqrt(head_size)

    # Fold the 1/sqrt(Dh) score scale into the Q projection (free).
    wq = params["wq"] * scale
    bq = params["bq"] * scale

    if (q is k) and (k is v):
        # Self-attention: fuse Q/K/V projections into one [D, 3D] matmul.
        w_qkv = jnp.concatenate([wq, params["wk"], params["wv"]], axis=1)
        b_qkv = jnp.concatenate([bq, params["bk"], params["bv"]])
        qkv = linear(q.reshape(B * Mq, D), w_qkv, b_qkv)           # [B*Mq, 3D]
        q_p, k_p, v_p = qkv[:, :D], qkv[:, D:2 * D], qkv[:, 2 * D:]
    else:
        q_p = linear(q.reshape(B * Mq, D), wq, bq)
        k_p = linear(k.reshape(B * Mk, D), params["wk"], params["bk"])
        v_p = linear(v.reshape(B * Mk, D), params["wv"], params["bv"])

    # Head "split" is a free contiguous reshape — no HBM transpose.
    q_h = q_p.reshape(B, Mq, num_heads, head_size)
    k_h = k_p.reshape(B, Mk, num_heads, head_size)
    v_h = v_p.reshape(B, Mk, num_heads, head_size)

    if mask is None:
        mask_i = jnp.ones((B, 1, Mk), dtype=jnp.int32)
    else:
        mask_i = mask.reshape(B, 1, Mk).astype(jnp.int32)

    ctx = attention_core(q_h, k_h, v_h, mask_i,
                         block_q=block_q, block_kv=block_kv)        # [B, Mq, D]

    out = linear(ctx.reshape(B * Mq, D), params["wo"], params["bo"])
    return out.reshape(B, Mq, D)


# ---------------------------------------------------------------------------
# Pure-JAX reference
# ---------------------------------------------------------------------------
def mha_reference(params, k, v, q, mask, num_heads):
    B, Mq, D = q.shape
    Mk = k.shape[1]
    Dh = D // num_heads

    def lin(x, w, b):
        return x @ w + b

    def split(x, m):
        return x.reshape(B, m, num_heads, Dh).transpose(0, 2, 1, 3)

    qh = split(lin(q, params["wq"], params["bq"]), Mq) / math.sqrt(Dh)
    kh = split(lin(k, params["wk"], params["bk"]), Mk)
    vh = split(lin(v, params["wv"], params["bv"]), Mk)
    scores = jnp.einsum("bhqd,bhkd->bhqk", qh, kh)
    if mask is not None:
        keep = mask.reshape(B, 1, 1, Mk).astype(bool)
        scores = jnp.where(keep, scores, _MASK_VALUE)
    attn = jax.nn.softmax(scores, axis=-1)
    ctx = jnp.einsum("bhqk,bhkd->bhqd", attn, vh)
    ctx = ctx.transpose(0, 2, 1, 3).reshape(B, Mq, D)
    return lin(ctx, params["wo"], params["bo"])


# ---------------------------------------------------------------------------
# tests
# ---------------------------------------------------------------------------
if __name__ == "__main__":
    key = jax.random.PRNGKey(0)
    B, M, D, H = 2, 8, 32, 4

    ks = jax.random.split(key, 12)
    w_scale = 1.0 / math.sqrt(D)
    params = {
        "wq": jax.random.normal(ks[0], (D, D), jnp.float32) * w_scale,
        "bq": jax.random.normal(ks[1], (D,), jnp.float32) * 0.1,
        "wk": jax.random.normal(ks[2], (D, D), jnp.float32) * w_scale,
        "bk": jax.random.normal(ks[3], (D,), jnp.float32) * 0.1,
        "wv": jax.random.normal(ks[4], (D, D), jnp.float32) * w_scale,
        "bv": jax.random.normal(ks[5], (D,), jnp.float32) * 0.1,
        "wo": jax.random.normal(ks[6], (D, D), jnp.float32) * w_scale,
        "bo": jax.random.normal(ks[7], (D,), jnp.float32) * 0.1,
    }

    q = jax.random.normal(ks[8], (B, M, D), jnp.float32)
    k = jax.random.normal(ks[9], (B, M, D), jnp.float32)
    v = jax.random.normal(ks[10], (B, M, D), jnp.float32)
    # mask: batch 0 fully valid; batch 1 has its last 2 key positions padded out.
    mask = jnp.ones((B, 1, M), dtype=jnp.int32).at[1, 0, M - 2:].set(0)

    # bf16 MXU operands -> compare against the f32 reference with bf16-level tolerance.
    ATOL = RTOL = 2e-2

    # Case 1: distinct q/k/v (general path) with a padding mask.
    out1 = jax.block_until_ready(
        multi_headed_attention(params, k, v, q, mask, num_heads=H))
    ref1 = mha_reference(params, k, v, q, mask, H)
    assert out1.shape == (B, M, D)
    err1 = float(jnp.max(jnp.abs(out1 - ref1)))
    assert jnp.allclose(out1, ref1, atol=ATOL, rtol=RTOL), f"case1 mismatch, max_err={err1}"

    # Case 2: self-attention (same tensor) -> fused QKV projection path.
    out2 = jax.block_until_ready(
        multi_headed_attention(params, q, q, q, mask, num_heads=H))
    ref2 = mha_reference(params, q, q, q, mask, H)
    err2 = float(jnp.max(jnp.abs(out2 - ref2)))
    assert jnp.allclose(out2, ref2, atol=ATOL, rtol=RTOL), f"case2 mismatch, max_err={err2}"

    # Case 3: non-tile-divisible sequence (pad + mask path), no user mask.
    B3, M3 = 2, 100
    q3 = jax.random.normal(jax.random.fold_in(ks[11], 0), (B3, M3, D), jnp.float32)
    k3 = jax.random.normal(jax.random.fold_in(ks[11], 1), (B3, M3, D), jnp.float32)
    v3 = jax.random.normal(jax.random.fold_in(ks[11], 2), (B3, M3, D), jnp.float32)
    out3 = jax.block_until_ready(
        multi_headed_attention(params, k3, v3, q3, None, num_heads=H,
                               block_q=64, block_kv=128))
    ref3 = mha_reference(params, k3, v3, q3, None, H)
    assert out3.shape == (B3, M3, D)
    err3 = float(jnp.max(jnp.abs(out3 - ref3)))
    assert jnp.allclose(out3, ref3, atol=ATOL, rtol=RTOL), f"case3 mismatch, max_err={err3}"

    print("KERNEL_OK")
</pallas_src>

<mosaic_0001>
module attributes {stable_mosaic.version = 11 : i64} {
  func.func @_linear_kernel(%arg0: i32, %arg1: i32, %arg2: i32, %arg3: memref<16x32xf32, #tpu.memory_space<vmem>>, %arg4: memref<32x32xf32, #tpu.memory_space<vmem>>, %arg5: memref<1x32xf32, #tpu.memory_space<vmem>>, %arg6: memref<16x32xf32, #tpu.memory_space<vmem>>, %arg7: memref<16x32xf32, #tpu.memory_space<vmem>>) attributes {dimension_semantics = [#tpu.dimension_semantics<parallel>, #tpu.dimension_semantics<parallel>, #tpu.dimension_semantics<arbitrary>], iteration_bounds = array<i64: 1, 1, 1>, scalar_prefetch = 0 : i64, scratch_operands = 1 : i64, tpu.core_type = #tpu.core_type<tc>, window_params = [{transform_indices = @transform_0, window_bounds = array<i64: 16, 32>}, {transform_indices = @transform_1, window_bounds = array<i64: 32, 32>}, {transform_indices = @transform_2, window_bounds = array<i64: 1, 32>}, {transform_indices = @transform_3, window_bounds = array<i64: 16, 32>}]} {
    %c0_i32 = arith.constant 0 : i32
    %0 = arith.cmpi eq, %arg2, %c0_i32 : i32
    %1 = arith.extui %0 : i1 to i32
    %c0_i32_0 = arith.constant 0 : i32
    %2 = arith.cmpi ne, %1, %c0_i32_0 : i32
    scf.if %2 {
      %cst_10 = arith.constant 0.000000e+00 : f32
      %14 = vector.broadcast %cst_10 : f32 to vector<16x32xf32>
      %c0_11 = arith.constant 0 : index
      %c0_12 = arith.constant 0 : index
      %15 = vector.load %arg7[%c0_11, %c0_12] : memref<16x32xf32, #tpu.memory_space<vmem>>, vector<16x32xf32>
      tpu.vector_store %arg7[%c0_11, %c0_12], %14 {strides = array<i32>} : memref<16x32xf32, #tpu.memory_space<vmem>>, vector<16x32xf32>,
    } else {
    }
    %c0 = arith.constant 0 : index
    %c0_1 = arith.constant 0 : index
    %3 = vector.load %arg7[%c0, %c0_1] : memref<16x32xf32, #tpu.memory_space<vmem>>, vector<16x32xf32>
    %c0_2 = arith.constant 0 : index
    %c0_3 = arith.constant 0 : index
    %4 = vector.load %arg3[%c0_2, %c0_3] : memref<16x32xf32, #tpu.memory_space<vmem>>, vector<16x32xf32>
    %5 = arith.truncf %4 : vector<16x32xf32> to vector<16x32xbf16>
    %c0_4 = arith.constant 0 : index
    %c0_5 = arith.constant 0 : index
    %6 = vector.load %arg4[%c0_4, %c0_5] : memref<32x32xf32, #tpu.memory_space<vmem>>, vector<32x32xf32>
    %7 = arith.truncf %6 : vector<32x32xf32> to vector<32x32xbf16>
    %cst = arith.constant dense<0.000000e+00> : vector<16x32xf32>
    %8 = tpu.matmul %5, %7, %cst {dimension_numbers = #tpu.dot_dimension_numbers<[1], [0], [0], [1], [0, 0, 1, 1], [], []>} : vector<16x32xbf16>, vector<32x32xbf16>, vector<16x32xf32> -> vector<16x32xf32>
    %9 = arith.addf %3, %8 : vector<16x32xf32>
    %c0_6 = arith.constant 0 : index
    %c0_7 = arith.constant 0 : index
    %10 = vector.load %arg7[%c0_6, %c0_7] : memref<16x32xf32, #tpu.memory_space<vmem>>, vector<16x32xf32>
    tpu.vector_store %arg7[%c0_6, %c0_7], %9 {strides = array<i32>} : memref<16x32xf32, #tpu.memory_space<vmem>>, vector<16x32xf32>,
    %c0_i32_8 = arith.constant 0 : i32
    %11 = arith.cmpi eq, %arg2, %c0_i32_8 : i32
    %12 = arith.extui %11 : i1 to i32
    %c0_i32_9 = arith.constant 0 : i32
    %13 = arith.cmpi ne, %12, %c0_i32_9 : i32
    scf.if %13 {
      %c0_10 = arith.constant 0 : index
      %c0_11 = arith.constant 0 : index
      %14 = vector.load %arg7[%c0_10, %c0_11] : memref<16x32xf32, #tpu.memory_space<vmem>>, vector<16x32xf32>
      %c0_12 = arith.constant 0 : index
      %c0_13 = arith.constant 0 : index
      %15 = vector.load %arg5[%c0_12, %c0_13] : memref<1x32xf32, #tpu.memory_space<vmem>>, vector<1x32xf32>
      %16 = vector.broadcast %15 : vector<1x32xf32> to vector<16x32xf32>
      %17 = arith.addf %14, %16 : vector<16x32xf32>
      %c0_14 = arith.constant 0 : index
      %c0_15 = arith.constant 0 : index
      %18 = vector.load %arg6[%c0_14, %c0_15] : memref<16x32xf32, #tpu.memory_space<vmem>>, vector<16x32xf32>
      tpu.vector_store %arg6[%c0_14, %c0_15], %17 {strides = array<i32>} : memref<16x32xf32, #tpu.memory_space<vmem>>, vector<16x32xf32>,
    } else {
    }
    return
  }
  func.func @transform_0(%arg0: i32, %arg1: i32, %arg2: i32) -> (i32, i32) {
    %c0_i32 = arith.constant 0 : i32
    return %arg0, %arg2 : i32, i32
  }
  func.func @transform_1(%arg0: i32, %arg1: i32, %arg2: i32) -> (i32, i32) {
    %c0_i32 = arith.constant 0 : i32
    return %arg2, %arg1 : i32, i32
  }
  func.func @transform_2(%arg0: i32, %arg1: i32, %arg2: i32) -> (i32, i32) {
    %c0_i32 = arith.constant 0 : i32
    %c0_i32_0 = arith.constant 0 : i32
    return %c0_i32, %arg1 : i32, i32
  }
  func.func @transform_3(%arg0: i32, %arg1: i32, %arg2: i32) -> (i32, i32) {
    %c0_i32 = arith.constant 0 : i32
    return %arg0, %arg1 : i32, i32
  }
}

</mosaic_0001>

<bundles_post_ra>
// kernel: tpu_custom_call.1
= control target key start
LH: loop header
LB: loop body
LE: loop exit
PB: predicated region body
PF: predicated region fallthrough
CT: control target
= control target key end

     0   :  { %8 = vsyncpa [#allocation4], 0  ;;  %s261_s0 = inlined_call_operand.hbm [shape: f32[16,32], index: 0, kind: input, shape index: {}]   ;;  %s262_s1 = inlined_call_operand.hbm [shape: f32[32,32], index: 1, kind: input, shape index: {}]   ;;  %s263_s2 = inlined_call_operand.vmem [shape: f32[1,32], index: 2, kind: input, shape index: {}]   ;;  %s264_s3 = inlined_call_operand.hbm [shape: f32[16,32], index: 3, kind: output, shape index: {}]  }
   0x1   :  { %9 = vsyncpa [#allocation7], 0 }
   0x2   :  { %10 = vsyncpa [#allocation5], 0  ;;  %s15_s14 = sshll.u32 %s261_s0, 4  ;;  %s207_s15 = smov [#allocation3]   ;;  %s16_s14 = int_to_ptr.hbm [resolvable:$true] %s15_s14 }
   0x3   :  { %s17_s16 = sshll.u32 %s207_s15, 4  ;;  %s28_s19 = sshll.u32 %s262_s1, 4  ;;  %s18_s16 = int_to_ptr.vmem [resolvable:$true] %s17_s16  ;;  %s29_s19 = int_to_ptr.hbm [resolvable:$true] %s28_s19 }
   0x4   :  { %s208_s20 = smov 128   ;;  %s209_s21 = smov 8  }
   0x5   :  { %23 = dma.hbm_to_vmem [thread:$0]  %s16_s14, 256, %s18_s16, [#allocation4], %s208_s20, %s208_s20, %s209_s21  }
   0x6   :  { %s210_s22 = smov [#allocation6]  }
   0x7   :  { %s30_s23 = sshll.u32 %s210_s22, 4  ;;  %s31_s23 = int_to_ptr.vmem [resolvable:$true] %s30_s23 }
   0x8   :  { %36 = dma.hbm_to_vmem [thread:$0]  %s29_s19, 512, %s31_s23, [#allocation7], %s208_s20, %s208_s20, %s209_s21  }
   0x9   :  { %201 = dma.done.wait [#allocation4], 256  }
   0xa   :  { %202 = vsyncadd [#allocation4], 4294967040 }
   0xb   :  { %203 = dma.done.wait [#allocation7], 512  }
   0xc   :  { %204 = vsyncadd [#allocation7], 4294966784  ;;  %vm52_vm0 = vcmask 261120   ;;  %v211_v0 = vmov 0.0   ;;  %v62_v1 = vld [vmem:[#allocation6 + $0x10] sm:$0xff]  ;;  %v63_v2 = vld [vmem:[#allocation6 + $0x18] sm:$0xff] }
   0xd   :  { %53 = vst.msk [vmem:[#allocation2] sm:$0xff] %vm52_vm0, %v211_v0  ;;  %v60_v3 = vld [vmem:[#allocation6] sm:$0xff]  ;;  %v65_v4 = vpack.c.bf16 %v63_v2, %v62_v1  ;;  %v61_v5 = vld [vmem:[#allocation6 + $0x8] sm:$0xff]  ;;  %v57_v7 = vld [vmem:[#allocation3] sm:$0xff]  ;;  %s212_s24 = smov [#allocation8]   ;;  %s107_s28 = sshll.u32 %s264_s3, 4  ;;  %s108_s28 = int_to_ptr.hbm [resolvable:$true] %s107_s28 }
   0xe   :  { %54 = vst.msk [vmem:[#allocation2 + $0x8] sm:$0xff] %vm52_vm0, %v211_v0  ;;  %v64_v6 = vpack.c.bf16 %v61_v5, %v60_v3  ;;  %v58_v8 = vld [vmem:[#allocation3 + $0x8] sm:$0xff]  ;;  %v128_v14 = vld [vmem:[%s263_s2] ss:$0 sm:$0xff]  ;;  %s105_s25 = sshll.u32 %s212_s24, 4  ;;  %s106_s25 = int_to_ptr.vmem [resolvable:$true] %s105_s25 }
   0xf   :  { %76 = vmatpush.bf16.msra.mxu0 %v65_v4  ;;  %v59_v9 = vpack.c.bf16 %v58_v8, %v57_v7 }
  0x13   :  { %77 = vmatpush.bf16.msra.mxu0 %v64_v6 }
  0x14   :  { %v55_v10 = vld [vmem:[#allocation2] sm:$0xff] }
  0x15   :  { %v56_v13 = vld [vmem:[#allocation2 + $0x8] sm:$0xff] }
  0x16   :  { %121 = vmatmul.msk.bf16.vlgmr.msra.gmra.mxu0 %vm52_vm0, %v59_v9 }
  0x93   :  { %v79_v11 = vpop.f32.mrf.mxu0 }
  0x94   :  { %v84_v12 = vadd.f32 %v79_v11, %v55_v10 }
  0x96   :  { %86 = vst.msk [vmem:[#allocation2] sm:$0xff] %vm52_vm0, %v84_v12 }
  0x9b   :  { %v81_v15 = vpop.f32.mrf.mxu0 }
  0x9c   :  { %v85_v16 = vadd.f32 %v81_v15, %v56_v13 }
  0x9d   :  { %v91_v17 = vld [vmem:[#allocation2] sm:$0xff] }
  0x9e   :  { %87 = vst.msk [vmem:[#allocation2 + $0x8] sm:$0xff] %vm52_vm0, %v85_v16  ;;  %v97_v18 = vadd.f32 %v128_v14, %v91_v17 }
  0xa0   :  { %99 = vst.msk [vmem:[#allocation8] sm:$0xff] %vm52_vm0, %v97_v18 }
  0xa5   :  { %v92_v19 = vld [vmem:[#allocation2 + $0x8] sm:$0xff] }
  0xa6   :  { %v98_v20 = vadd.f32 %v128_v14, %v92_v19 }
  0xa8   :  { %100 = vst.msk [vmem:[#allocation8 + $0x8] sm:$0xff] %vm52_vm0, %v98_v20 }
  0xa9   :  { %113 = dma.vmem_to_hbm [thread:$0]  %s106_s25, 256, %s108_s28, [#allocation5], %s208_s20, %s208_s20, %s209_s21  }
  0xaa   :  { %205 = dma.done.wait [#allocation5], 256  }
  0xab   :  { %206 = vsyncadd [#allocation5], 4294967040 }
  0xac   :  { %118 = vsyncpa [#allocation4], 1 }
  0xad   :  { %119 = vsyncpa [#allocation7], 1 }
  0xae   :  { %120 = vsyncpa [#allocation5], 1 }

</bundles_post_ra>
